<compile_context>
chip_gen: v5e
topology: v5e:2x2
jax: 0.10.0
libtpu: 0.0.40
codegen_flags: <defaults>
</compile_context>

<pallas_src>
import functools

import jax
import jax.numpy as jnp
from jax.experimental import pallas as pl
from jax.experimental.pallas import tpu as pltpu


def _round_up(x, m):
    return ((x + m - 1) // m) * m


# --------------------------------------------------------------------------------------
# Kernel 1: attention for one (batch, head) grid point.
# QKV for this head come from ONE fused matmul against the per-head weight slice
# (scale already folded into the Q columns at prep time).
# --------------------------------------------------------------------------------------
def attention_kernel(x_ref, w_ref, b_ref, o_ref, *, head_dim, use_bf16):
    mxu = jnp.bfloat16 if use_bf16 else jnp.float32
    x = x_ref[0].astype(mxu)                                 # (l, d_model)
    w = w_ref[0]                                             # (d_model, 3*hd)  (mxu dtype)
    qkv = jnp.dot(x, w, preferred_element_type=jnp.float32) + b_ref[0]   # (l, 3*hd) f32

    q = qkv[:, :head_dim].astype(mxu)                        # scale pre-folded into W/b
    k = qkv[:, head_dim:2 * head_dim].astype(mxu)
    v = qkv[:, 2 * head_dim:].astype(mxu)

    # scores = q @ k^T  (contract last dims; no explicit transpose, no score scaling)
    s = jax.lax.dot_general(q, k, (((1,), (1,)), ((), ())),
                            preferred_element_type=jnp.float32)
    # softmax along the key axis (f32); reciprocal on the EUP slot
    s = s - jnp.max(s, axis=-1, keepdims=True)
    e = jnp.exp(s)
    p = e * pl.reciprocal(jnp.sum(e, axis=-1, keepdims=True), approx=use_bf16)

    o = jnp.dot(p.astype(mxu), v, preferred_element_type=jnp.float32)
    o_ref[0, 0] = o.astype(o_ref.dtype)


# --------------------------------------------------------------------------------------
# Kernel 2: (attn + residual) -> LayerNorm -> linear1 -> QuickGELU -> linear2 -> + residual.
# Grid: (row tiles [parallel], d_inner chunks [arbitrary reduction]).
# z (LayerNorm output == FFN input/residual) and the FFN accumulator live in VMEM scratch
# across the reduction axis.
# --------------------------------------------------------------------------------------
def add_ln_ffn_kernel(attn_ref, res_ref, gamma_ref, beta_ref, w1_ref, b1_ref,
                      w2_ref, b2_ref, o_ref, z_ref, acc_ref, *, eps, use_bf16):
    k = pl.program_id(1)
    nk = pl.num_programs(1)
    mxu = jnp.bfloat16 if use_bf16 else jnp.float32

    @pl.when(k == 0)
    def _init():
        # residual add + LayerNorm, computed once per row tile (f32).
        y = attn_ref[...].astype(jnp.float32) + res_ref[...].astype(jnp.float32)
        mu = jnp.mean(y, axis=-1, keepdims=True)
        yc = y - mu
        var = jnp.mean(yc * yc, axis=-1, keepdims=True)
        z = yc * jax.lax.rsqrt(var + eps)
        z_ref[...] = z * gamma_ref[...] + beta_ref[...]
        acc_ref[...] = jnp.zeros_like(acc_ref)

    # Partial FFN over this d_inner chunk: acc += gelu(z @ W1[:, chunk] + b1[chunk]) @ W2[chunk, :]
    z = z_ref[...]
    h = jnp.dot(z.astype(mxu), w1_ref[...],
                preferred_element_type=jnp.float32) + b1_ref[...]
    h = h * jax.nn.sigmoid(1.702 * h)                        # QuickGELU in f32
    acc_ref[...] += jnp.dot(h.astype(mxu), w2_ref[...],
                            preferred_element_type=jnp.float32)

    @pl.when(k == nk - 1)
    def _finalize():
        # b2 and the FFN residual (z) are added exactly once, at finalize.
        o_ref[...] = (acc_ref[...] + b2_ref[...] + z_ref[...]).astype(o_ref.dtype)


# --------------------------------------------------------------------------------------
# One-time parameter preparation (hoisted out of the jitted forward).
# --------------------------------------------------------------------------------------
def prepare_encoder_params(wqkv, bqkv, gamma, beta, w1, b1, w2, b2,
                           *, num_heads, tk=1024, use_bf16=True):
    """Weights stored (in_features, out_features). Runs once at model-load time."""
    d_model = wqkv.shape[0]
    hd = d_model // num_heads
    assert hd * num_heads == d_model
    scale = float(hd) ** -0.5
    wdt = jnp.bfloat16 if use_bf16 else jnp.float32

    # Per-head fused QKV weight (num_heads, d_model, 3*hd), matching torch's head-interleaved
    # reshape/permute/chunk: output column h*3*hd + t*hd + d -> (head h, {q,k,v}=t, dim d).
    w_heads = jnp.transpose(wqkv.reshape(d_model, num_heads, 3 * hd), (1, 0, 2))
    b_heads = bqkv.reshape(num_heads, 1, 3 * hd).astype(jnp.float32)
    # Fold the attention scale into the Q columns (weight AND bias).
    q_scale = jnp.concatenate([jnp.full((hd,), scale, jnp.float32),
                               jnp.ones((2 * hd,), jnp.float32)])
    w_heads = (w_heads.astype(jnp.float32) * q_scale).astype(wdt)
    b_heads = b_heads * q_scale

    # Pad d_inner once (zero columns of W1 / zero rows of W2 contribute exactly 0) so the
    # reduction grid axis divides evenly.
    d_inner = w1.shape[1]
    if d_inner > tk:
        kpad = _round_up(d_inner, tk)
        w1 = jnp.pad(w1, ((0, 0), (0, kpad - d_inner)))
        b1 = jnp.pad(b1, ((0, kpad - d_inner),))
        w2 = jnp.pad(w2, ((0, kpad - d_inner), (0, 0)))

    return dict(
        w_heads=jnp.asarray(w_heads),
        b_heads=jnp.asarray(b_heads),
        gamma=gamma.reshape(1, d_model).astype(jnp.float32),
        beta=beta.reshape(1, d_model).astype(jnp.float32),
        w1=w1.astype(wdt),
        b1=b1.reshape(1, -1).astype(jnp.float32),
        w2=w2.astype(wdt),
        b2=b2.reshape(1, d_model).astype(jnp.float32),
    )


# --------------------------------------------------------------------------------------
# Jitted forward (consumes prepared params only — no per-call weight reshaping/casting).
# --------------------------------------------------------------------------------------
@functools.partial(jax.jit, static_argnames=("num_heads", "tm", "tk", "use_bf16"))
def encoder_layer_forward(x, params, *, num_heads, tm=512, tk=1024, use_bf16=True):
    """x: (batch, seq, d_model)."""
    b, l, d_model = x.shape
    hd = d_model // num_heads
    out_dtype = x.dtype
    attn_dtype = jnp.bfloat16 if use_bf16 else jnp.float32

    # ---- attention: grid over (batch, head) -------------------------------------------
    attn = pl.pallas_call(
        functools.partial(attention_kernel, head_dim=hd, use_bf16=use_bf16),
        out_shape=jax.ShapeDtypeStruct((b, num_heads, l, hd), attn_dtype),
        grid_spec=pltpu.PrefetchScalarGridSpec(
            num_scalar_prefetch=0,
            grid=(b, num_heads),
            in_specs=[
                pl.BlockSpec((1, l, d_model), lambda i, h: (i, 0, 0)),     # x (reused over h)
                pl.BlockSpec((1, d_model, 3 * hd), lambda i, h: (h, 0, 0)),  # per-head W
                pl.BlockSpec((1, 1, 3 * hd), lambda i, h: (h, 0, 0)),        # per-head bias
            ],
            out_specs=pl.BlockSpec((1, 1, l, hd), lambda i, h: (i, h, 0, 0)),
        ),
        compiler_params=pltpu.CompilerParams(
            dimension_semantics=("parallel", "parallel"),
            vmem_limit_bytes=32 * 1024 * 1024),
    )(x, params["w_heads"], params["b_heads"])

    # torch does `x.reshape(b, l, d_model)` directly on the (b, heads, l, hd) tensor —
    # a row-major reinterpretation, reproduced here as a free reshape (no compute).
    attn_rows = attn.reshape(b * l, d_model)
    res_rows = x.reshape(b * l, d_model)

    # ---- add + LN + FFN: grid over (row tiles, d_inner chunks) ------------------------
    M = b * l
    tm_eff = M if M <= tm else tm                     # tm is a multiple of 8; M<=tm => full dim
    grid_m = pl.cdiv(M, tm_eff)                        # ragged tail handled by partial blocks

    w1 = params["w1"]
    kpad = w1.shape[1]
    tk_eff = kpad if kpad <= tk else tk                # prep guarantees kpad % tk == 0 here
    grid_k = kpad // tk_eff

    out_rows = pl.pallas_call(
        functools.partial(add_ln_ffn_kernel, eps=1e-5, use_bf16=use_bf16),
        out_shape=jax.ShapeDtypeStruct((M, d_model), out_dtype),
        grid_spec=pltpu.PrefetchScalarGridSpec(
            num_scalar_prefetch=0,
            grid=(grid_m, grid_k),
            in_specs=[
                pl.BlockSpec((tm_eff, d_model), lambda i, k: (i, 0)),   # attention rows (bf16)
                pl.BlockSpec((tm_eff, d_model), lambda i, k: (i, 0)),   # residual rows
                pl.BlockSpec((1, d_model), lambda i, k: (0, 0)),        # LN gamma
                pl.BlockSpec((1, d_model), lambda i, k: (0, 0)),        # LN beta
                pl.BlockSpec((d_model, tk_eff), lambda i, k: (0, k)),   # W1 chunk
                pl.BlockSpec((1, tk_eff), lambda i, k: (0, k)),         # b1 chunk
                pl.BlockSpec((tk_eff, d_model), lambda i, k: (k, 0)),   # W2 chunk
                pl.BlockSpec((1, d_model), lambda i, k: (0, 0)),        # b2
            ],
            out_specs=pl.BlockSpec((tm_eff, d_model), lambda i, k: (i, 0)),
            scratch_shapes=[
                pltpu.VMEM((tm_eff, d_model), jnp.float32),   # z: LN output / FFN residual
                pltpu.VMEM((tm_eff, d_model), jnp.float32),   # FFN accumulator
            ],
        ),
        compiler_params=pltpu.CompilerParams(
            dimension_semantics=("parallel", "arbitrary"),
            vmem_limit_bytes=40 * 1024 * 1024),
    )(attn_rows, res_rows, params["gamma"], params["beta"],
      w1, params["b1"], params["w2"], params["b2"])

    return out_rows.reshape(b, l, d_model)


# --------------------------------------------------------------------------------------
# Pure-JAX reference (exact torch semantics, f32, highest matmul precision)
# --------------------------------------------------------------------------------------
def reference_encoder_layer(x, wqkv, bqkv, gamma, beta, w1, b1, w2, b2, num_heads):
    hp = jax.lax.Precision.HIGHEST
    b, l, d = x.shape
    hd = d // num_heads
    res = x
    qkv = jnp.dot(x, wqkv, precision=hp) + bqkv
    qkv = qkv.reshape(b, l, num_heads, 3 * hd).transpose(0, 2, 1, 3)
    q, k, v = jnp.split(qkv, 3, axis=-1)
    scale = float(hd) ** -0.5
    s = jnp.einsum("bhqd,bhkd->bhqk", q, k, precision=hp) * scale
    p = jax.nn.softmax(s, axis=-1)
    a = jnp.einsum("bhqk,bhkd->bhqd", p, v, precision=hp)
    a = a.reshape(b, l, d)                       # torch's reshape (no head transpose back)
    y = a + res
    mu = y.mean(-1, keepdims=True)
    var = ((y - mu) ** 2).mean(-1, keepdims=True)
    z = (y - mu) / jnp.sqrt(var + 1e-5) * gamma + beta
    h = jnp.dot(z, w1, precision=hp) + b1
    h = h * jax.nn.sigmoid(1.702 * h)
    out = jnp.dot(h, w2, precision=hp) + b2
    return out + z


if __name__ == "__main__":
    B, S, D_MODEL, D_INNER, NUM_HEADS = 2, 8, 32, 64, 4

    key = jax.random.PRNGKey(0)
    keys = jax.random.split(key, 8)

    def uinit(k, shape, fan_in):
        bound = 1.0 / (fan_in ** 0.5)
        return jax.random.uniform(k, shape, jnp.float32, minval=-bound, maxval=bound)

    x = jax.random.normal(keys[0], (B, S, D_MODEL), dtype=jnp.float32)
    wqkv = uinit(keys[1], (D_MODEL, 3 * D_MODEL), D_MODEL)
    bqkv = uinit(keys[2], (3 * D_MODEL,), D_MODEL)
    gamma = jnp.ones((D_MODEL,), jnp.float32)
    beta = jnp.zeros((D_MODEL,), jnp.float32)
    w1 = uinit(keys[3], (D_MODEL, D_INNER), D_MODEL)
    b1 = uinit(keys[4], (D_INNER,), D_MODEL)
    w2 = uinit(keys[5], (D_INNER, D_MODEL), D_INNER)
    b2 = uinit(keys[6], (D_MODEL,), D_INNER)

    ref = reference_encoder_layer(x, wqkv, bqkv, gamma, beta, w1, b1, w2, b2, NUM_HEADS)

    # Exact-precision path (f32 MXU operands, exact reciprocal) — tightened tolerance.
    params_f32 = prepare_encoder_params(wqkv, bqkv, gamma, beta, w1, b1, w2, b2,
                                        num_heads=NUM_HEADS, use_bf16=False)
    out_f32 = encoder_layer_forward(x, params_f32, num_heads=NUM_HEADS, use_bf16=False)
    out_f32 = jax.block_until_ready(out_f32)
    assert out_f32.shape == x.shape and out_f32.dtype == x.dtype
    assert jnp.allclose(out_f32, ref, atol=1e-3, rtol=1e-3), (
        "f32 kernel mismatch, max|diff|=%e" % float(jnp.max(jnp.abs(out_f32 - ref))))

    # Fast path (bf16 MXU operands + bf16 attn handoff, f32 accumulation).
    params_bf16 = prepare_encoder_params(wqkv, bqkv, gamma, beta, w1, b1, w2, b2,
                                         num_heads=NUM_HEADS, use_bf16=True)
    out_bf16 = encoder_layer_forward(x, params_bf16, num_heads=NUM_HEADS, use_bf16=True)
    out_bf16 = jax.block_until_ready(out_bf16)
    assert out_bf16.shape == x.shape and out_bf16.dtype == x.dtype
    assert jnp.allclose(out_bf16, ref, atol=5e-2, rtol=5e-2), (
        "bf16 kernel mismatch, max|diff|=%e" % float(jnp.max(jnp.abs(out_bf16 - ref))))

    print("KERNEL_OK")
</pallas_src>

<mosaic_0001>
module attributes {stable_mosaic.version = 11 : i64} {
  func.func @attention_kernel(%arg0: i32, %arg1: i32, %arg2: memref<1x8x32xf32, #tpu.memory_space<vmem>>, %arg3: memref<1x32x24xf32, #tpu.memory_space<vmem>>, %arg4: memref<1x1x24xf32, #tpu.memory_space<vmem>>, %arg5: memref<1x1x8x8xf32, #tpu.memory_space<vmem>>) attributes {dimension_semantics = [#tpu.dimension_semantics<parallel>, #tpu.dimension_semantics<parallel>], iteration_bounds = array<i64: 2, 4>, scalar_prefetch = 0 : i64, scratch_operands = 0 : i64, tpu.core_type = #tpu.core_type<tc>, window_params = [{transform_indices = @transform_0, window_bounds = array<i64: 1, 8, 32>}, {transform_indices = @transform_1, window_bounds = array<i64: 1, 32, 24>}, {transform_indices = @transform_2, window_bounds = array<i64: 1, 1, 24>}, {transform_indices = @transform_3, window_bounds = array<i64: 1, 1, 8, 8>}]} {
    %c0 = arith.constant 0 : index
    %c0_0 = arith.constant 0 : index
    %c0_1 = arith.constant 0 : index
    %0 = vector.load %arg2[%c0, %c0_0, %c0_1] : memref<1x8x32xf32, #tpu.memory_space<vmem>>, vector<1x8x32xf32>
    %1 = vector.shape_cast %0 : vector<1x8x32xf32> to vector<8x32xf32>
    %c0_2 = arith.constant 0 : index
    %c0_3 = arith.constant 0 : index
    %c0_4 = arith.constant 0 : index
    %2 = vector.load %arg3[%c0_2, %c0_3, %c0_4] : memref<1x32x24xf32, #tpu.memory_space<vmem>>, vector<1x32x24xf32>
    %3 = vector.shape_cast %2 : vector<1x32x24xf32> to vector<32x24xf32>
    %cst = arith.constant dense<0.000000e+00> : vector<8x24xf32>
    %4 = tpu.matmul %1, %3, %cst {dimension_numbers = #tpu.dot_dimension_numbers<[1], [0], [0], [1], [0, 0, 1, 1], [], []>} : vector<8x32xf32>, vector<32x24xf32>, vector<8x24xf32> -> vector<8x24xf32>
    %c0_5 = arith.constant 0 : index
    %c0_6 = arith.constant 0 : index
    %c0_7 = arith.constant 0 : index
    %5 = vector.load %arg4[%c0_5, %c0_6, %c0_7] : memref<1x1x24xf32, #tpu.memory_space<vmem>>, vector<1x1x24xf32>
    %6 = vector.shape_cast %5 : vector<1x1x24xf32> to vector<1x24xf32>
    %7 = vector.broadcast %6 : vector<1x24xf32> to vector<8x24xf32>
    %8 = arith.addf %4, %7 : vector<8x24xf32>
    %9 = vector.extract_strided_slice %8 {offsets = [0, 0], sizes = [8, 8], strides = [1, 1]} : vector<8x24xf32> to vector<8x8xf32>
    %10 = vector.extract_strided_slice %8 {offsets = [0, 8], sizes = [8, 8], strides = [1, 1]} : vector<8x24xf32> to vector<8x8xf32>
    %11 = vector.extract_strided_slice %8 {offsets = [0, 16], sizes = [8, 8], strides = [1, 1]} : vector<8x24xf32> to vector<8x8xf32>
    %cst_8 = arith.constant dense<0.000000e+00> : vector<8x8xf32>
    %12 = tpu.matmul %9, %10, %cst_8 {dimension_numbers = #tpu.dot_dimension_numbers<[1], [1], [0], [0], [0, 0, 1, 0], [], []>} : vector<8x8xf32>, vector<8x8xf32>, vector<8x8xf32> -> vector<8x8xf32>
    %cst_9 = arith.constant dense<0xFF800000> : vector<8xf32>
    %13 = vector.multi_reduction <maximumf>, %12, %cst_9 [1] : vector<8x8xf32> to vector<8xf32>
    %14 = vector.shape_cast %13 : vector<8xf32> to vector<8x1xf32>
    %15 = vector.broadcast %14 : vector<8x1xf32> to vector<8x8xf32>
    %16 = arith.subf %12, %15 : vector<8x8xf32>
    %17 = math.exp %16 : vector<8x8xf32>
    %cst_10 = arith.constant dense<0.000000e+00> : vector<8xf32>
    %18 = vector.multi_reduction <add>, %17, %cst_10 [1] : vector<8x8xf32> to vector<8xf32>
    %19 = vector.shape_cast %18 : vector<8xf32> to vector<8x1xf32>
    %20 = tpu.reciprocal %19 : vector<8x1xf32> -> vector<8x1xf32>
    %21 = vector.broadcast %20 : vector<8x1xf32> to vector<8x8xf32>
    %22 = arith.mulf %17, %21 : vector<8x8xf32>
    %cst_11 = arith.constant dense<0.000000e+00> : vector<8x8xf32>
    %23 = tpu.matmul %22, %11, %cst_11 {dimension_numbers = #tpu.dot_dimension_numbers<[1], [0], [0], [1], [0, 0, 1, 1], [], []>} : vector<8x8xf32>, vector<8x8xf32>, vector<8x8xf32> -> vector<8x8xf32>
    %c0_12 = arith.constant 0 : index
    %c0_13 = arith.constant 0 : index
    %c0_14 = arith.constant 0 : index
    %c0_15 = arith.constant 0 : index
    %24 = vector.load %arg5[%c0_12, %c0_13, %c0_14, %c0_15] : memref<1x1x8x8xf32, #tpu.memory_space<vmem>>, vector<1x1x8x8xf32>
    %25 = vector.shape_cast %24 : vector<1x1x8x8xf32> to vector<8x8xf32>
    %26 = vector.shape_cast %23 : vector<8x8xf32> to vector<1x1x8x8xf32>
    tpu.vector_store %arg5[%c0_12, %c0_13, %c0_14, %c0_15], %26 {strides = array<i32>} : memref<1x1x8x8xf32, #tpu.memory_space<vmem>>, vector<1x1x8x8xf32>,
    return
  }
  func.func @transform_0(%arg0: i32, %arg1: i32) -> (i32, i32, i32) {
    %c0_i32 = arith.constant 0 : i32
    %c0_i32_0 = arith.constant 0 : i32
    %c0_i32_1 = arith.constant 0 : i32
    return %arg0, %c0_i32, %c0_i32_0 : i32, i32, i32
  }
  func.func @transform_1(%arg0: i32, %arg1: i32) -> (i32, i32, i32) {
    %c0_i32 = arith.constant 0 : i32
    %c0_i32_0 = arith.constant 0 : i32
    %c0_i32_1 = arith.constant 0 : i32
    return %arg1, %c0_i32, %c0_i32_0 : i32, i32, i32
  }
  func.func @transform_2(%arg0: i32, %arg1: i32) -> (i32, i32, i32) {
    %c0_i32 = arith.constant 0 : i32
    %c0_i32_0 = arith.constant 0 : i32
    %c0_i32_1 = arith.constant 0 : i32
    return %arg1, %c0_i32, %c0_i32_0 : i32, i32, i32
  }
  func.func @transform_3(%arg0: i32, %arg1: i32) -> (i32, i32, i32, i32) {
    %c0_i32 = arith.constant 0 : i32
    %c0_i32_0 = arith.constant 0 : i32
    %c0_i32_1 = arith.constant 0 : i32
    return %arg0, %arg1, %c0_i32, %c0_i32_0 : i32, i32, i32, i32
  }
}

module attributes {stable_mosaic.version = 11 : i64} {
  func.func @add_ln_ffn_kernel(%arg0: i32, %arg1: i32, %arg2: memref<16x32xf32, #tpu.memory_space<vmem>>, %arg3: memref<16x32xf32, #tpu.memory_space<vmem>>, %arg4: memref<1x32xf32, #tpu.memory_space<vmem>>, %arg5: memref<1x32xf32, #tpu.memory_space<vmem>>, %arg6: memref<32x64xf32, #tpu.memory_space<vmem>>, %arg7: memref<1x64xf32, #tpu.memory_space<vmem>>, %arg8: memref<64x32xf32, #tpu.memory_space<vmem>>, %arg9: memref<1x32xf32, #tpu.memory_space<vmem>>, %arg10: memref<16x32xf32, #tpu.memory_space<vmem>>, %arg11: memref<16x32xf32, #tpu.memory_space<vmem>>, %arg12: memref<16x32xf32, #tpu.memory_space<vmem>>) attributes {dimension_semantics = [#tpu.dimension_semantics<parallel>, #tpu.dimension_semantics<arbitrary>], iteration_bounds = array<i64: 1, 1>, scalar_prefetch = 0 : i64, scratch_operands = 2 : i64, tpu.core_type = #tpu.core_type<tc>, window_params = [{transform_indices = @transform_0, window_bounds = array<i64: 16, 32>}, {transform_indices = @transform_1, window_bounds = array<i64: 16, 32>}, {pipeline_mode = #tpu.pipeline_mode<synchronous>, transform_indices = @transform_2, window_bounds = array<i64: 1, 32>}, {pipeline_mode = #tpu.pipeline_mode<synchronous>, transform_indices = @transform_3, window_bounds = array<i64: 1, 32>}, {transform_indices = @transform_4, window_bounds = array<i64: 32, 64>}, {transform_indices = @transform_5, window_bounds = array<i64: 1, 64>}, {transform_indices = @transform_6, window_bounds = array<i64: 64, 32>}, {pipeline_mode = #tpu.pipeline_mode<synchronous>, transform_indices = @transform_7, window_bounds = array<i64: 1, 32>}, {transform_indices = @transform_8, window_bounds = array<i64: 16, 32>}]} {
    %c0_i32 = arith.constant 0 : i32
    %0 = arith.cmpi eq, %arg1, %c0_i32 : i32
    %1 = arith.extui %0 : i1 to i32
    %c0_i32_0 = arith.constant 0 : i32
    %2 = arith.cmpi ne, %1, %c0_i32_0 : i32
    scf.if %2 {
      %c0_17 = arith.constant 0 : index
      %c0_18 = arith.constant 0 : index
      %25 = vector.load %arg2[%c0_17, %c0_18] : memref<16x32xf32, #tpu.memory_space<vmem>>, vector<16x32xf32>
      %c0_19 = arith.constant 0 : index
      %c0_20 = arith.constant 0 : index
      %26 = vector.load %arg3[%c0_19, %c0_20] : memref<16x32xf32, #tpu.memory_space<vmem>>, vector<16x32xf32>
      %27 = arith.addf %25, %26 : vector<16x32xf32>
      %cst_21 = arith.constant dense<0.000000e+00> : vector<16xf32>
      %28 = vector.multi_reduction <add>, %27, %cst_21 [1] : vector<16x32xf32> to vector<16xf32>
      %29 = vector.shape_cast %28 : vector<16xf32> to vector<16x1xf32>
      %cst_22 = arith.constant 3.200000e+01 : f32
      %30 = vector.broadcast %cst_22 : f32 to vector<16x1xf32>
      %31 = arith.divf %29, %30 : vector<16x1xf32>
      %32 = vector.broadcast %31 : vector<16x1xf32> to vector<16x32xf32>
      %33 = arith.subf %27, %32 : vector<16x32xf32>
      %34 = arith.mulf %33, %33 : vector<16x32xf32>
      %cst_23 = arith.constant dense<0.000000e+00> : vector<16xf32>
      %35 = vector.multi_reduction <add>, %34, %cst_23 [1] : vector<16x32xf32> to vector<16xf32>
      %36 = vector.shape_cast %35 : vector<16xf32> to vector<16x1xf32>
      %cst_24 = arith.constant 3.200000e+01 : f32
      %37 = vector.broadcast %cst_24 : f32 to vector<16x1xf32>
      %38 = arith.divf %36, %37 : vector<16x1xf32>
      %cst_25 = arith.constant 9.99999974E-6 : f32
      %39 = vector.broadcast %cst_25 : f32 to vector<16x1xf32>
      %40 = arith.addf %38, %39 : vector<16x1xf32>
      %41 = math.rsqrt %40 : vector<16x1xf32>
      %42 = vector.broadcast %41 : vector<16x1xf32> to vector<16x32xf32>
      %43 = arith.mulf %33, %42 : vector<16x32xf32>
      %c0_26 = arith.constant 0 : index
      %c0_27 = arith.constant 0 : index
      %44 = vector.load %arg4[%c0_26, %c0_27] : memref<1x32xf32, #tpu.memory_space<vmem>>, vector<1x32xf32>
      %45 = vector.broadcast %44 : vector<1x32xf32> to vector<16x32xf32>
      %46 = arith.mulf %43, %45 : vector<16x32xf32>
      %c0_28 = arith.constant 0 : index
      %c0_29 = arith.constant 0 : index
      %47 = vector.load %arg5[%c0_28, %c0_29] : memref<1x32xf32, #tpu.memory_space<vmem>>, vector<1x32xf32>
      %48 = vector.broadcast %47 : vector<1x32xf32> to vector<16x32xf32>
      %49 = arith.addf %46, %48 : vector<16x32xf32>
      %c0_30 = arith.constant 0 : index
      %c0_31 = arith.constant 0 : index
      %50 = vector.load %arg11[%c0_30, %c0_31] : memref<16x32xf32, #tpu.memory_space<vmem>>, vector<16x32xf32>
      tpu.vector_store %arg11[%c0_30, %c0_31], %49 {strides = array<i32>} : memref<16x32xf32, #tpu.memory_space<vmem>>, vector<16x32xf32>,
      %cst_32 = arith.constant 0.000000e+00 : f32
      %51 = vector.broadcast %cst_32 : f32 to vector<16x32xf32>
      %c0_33 = arith.constant 0 : index
      %c0_34 = arith.constant 0 : index
      %52 = vector.load %arg12[%c0_33, %c0_34] : memref<16x32xf32, #tpu.memory_space<vmem>>, vector<16x32xf32>
      tpu.vector_store %arg12[%c0_33, %c0_34], %51 {strides = array<i32>} : memref<16x32xf32, #tpu.memory_space<vmem>>, vector<16x32xf32>,
    } else {
    }
    %c0 = arith.constant 0 : index
    %c0_1 = arith.constant 0 : index
    %3 = vector.load %arg11[%c0, %c0_1] : memref<16x32xf32, #tpu.memory_space<vmem>>, vector<16x32xf32>
    %c0_2 = arith.constant 0 : index
    %c0_3 = arith.constant 0 : index
    %4 = vector.load %arg6[%c0_2, %c0_3] : memref<32x64xf32, #tpu.memory_space<vmem>>, vector<32x64xf32>
    %cst = arith.constant dense<0.000000e+00> : vector<16x64xf32>
    %5 = tpu.matmul %3, %4, %cst {dimension_numbers = #tpu.dot_dimension_numbers<[1], [0], [0], [1], [0, 0, 1, 1], [], []>} : vector<16x32xf32>, vector<32x64xf32>, vector<16x64xf32> -> vector<16x64xf32>
    %c0_4 = arith.constant 0 : index
    %c0_5 = arith.constant 0 : index
    %6 = vector.load %arg7[%c0_4, %c0_5] : memref<1x64xf32, #tpu.memory_space<vmem>>, vector<1x64xf32>
    %7 = vector.broadcast %6 : vector<1x64xf32> to vector<16x64xf32>
    %8 = arith.addf %5, %7 : vector<16x64xf32>
    %cst_6 = arith.constant 1.702000e+00 : f32
    %9 = vector.broadcast %cst_6 : f32 to vector<16x64xf32>
    %10 = arith.mulf %9, %8 : vector<16x64xf32>
    %11 = arith.negf %10 : vector<16x64xf32>
    %12 = math.exp %11 : vector<16x64xf32>
    %cst_7 = arith.constant 1.000000e+00 : f32
    %13 = vector.broadcast %cst_7 : f32 to vector<16x64xf32>
    %14 = arith.addf %13, %12 : vector<16x64xf32>
    %15 = arith.divf %13, %14 : vector<16x64xf32>
    %16 = arith.mulf %8, %15 : vector<16x64xf32>
    %c0_8 = arith.constant 0 : index
    %c0_9 = arith.constant 0 : index
    %17 = vector.load %arg12[%c0_8, %c0_9] : memref<16x32xf32, #tpu.memory_space<vmem>>, vector<16x32xf32>
    %c0_10 = arith.constant 0 : index
    %c0_11 = arith.constant 0 : index
    %18 = vector.load %arg8[%c0_10, %c0_11] : memref<64x32xf32, #tpu.memory_space<vmem>>, vector<64x32xf32>
    %cst_12 = arith.constant dense<0.000000e+00> : vector<16x32xf32>
    %19 = tpu.matmul %16, %18, %cst_12 {dimension_numbers = #tpu.dot_dimension_numbers<[1], [0], [0], [1], [0, 0, 1, 1], [], []>} : vector<16x64xf32>, vector<64x32xf32>, vector<16x32xf32> -> vector<16x32xf32>
    %20 = arith.addf %17, %19 : vector<16x32xf32>
    %c0_13 = arith.constant 0 : index
    %c0_14 = arith.constant 0 : index
    %21 = vector.load %arg12[%c0_13, %c0_14] : memref<16x32xf32, #tpu.memory_space<vmem>>, vector<16x32xf32>
    tpu.vector_store %arg12[%c0_13, %c0_14], %20 {strides = array<i32>} : memref<16x32xf32, #tpu.memory_space<vmem>>, vector<16x32xf32>,
    %c0_i32_15 = arith.constant 0 : i32
    %22 = arith.cmpi eq, %arg1, %c0_i32_15 : i32
    %23 = arith.extui %22 : i1 to i32
    %c0_i32_16 = arith.constant 0 : i32
    %24 = arith.cmpi ne, %23, %c0_i32_16 : i32
    scf.if %24 {
      %c0_17 = arith.constant 0 : index
      %c0_18 = arith.constant 0 : index
      %25 = vector.load %arg12[%c0_17, %c0_18] : memref<16x32xf32, #tpu.memory_space<vmem>>, vector<16x32xf32>
      %c0_19 = arith.constant 0 : index
      %c0_20 = arith.constant 0 : index
      %26 = vector.load %arg9[%c0_19, %c0_20] : memref<1x32xf32, #tpu.memory_space<vmem>>, vector<1x32xf32>
      %27 = vector.broadcast %26 : vector<1x32xf32> to vector<16x32xf32>
      %28 = arith.addf %25, %27 : vector<16x32xf32>
      %c0_21 = arith.constant 0 : index
      %c0_22 = arith.constant 0 : index
      %29 = vector.load %arg11[%c0_21, %c0_22] : memref<16x32xf32, #tpu.memory_space<vmem>>, vector<16x32xf32>
      %30 = arith.addf %28, %29 : vector<16x32xf32>
      %c0_23 = arith.constant 0 : index
      %c0_24 = arith.constant 0 : index
      %31 = vector.load %arg10[%c0_23, %c0_24] : memref<16x32xf32, #tpu.memory_space<vmem>>, vector<16x32xf32>
      tpu.vector_store %arg10[%c0_23, %c0_24], %30 {strides = array<i32>} : memref<16x32xf32, #tpu.memory_space<vmem>>, vector<16x32xf32>,
    } else {
    }
    return
  }
  func.func @transform_0(%arg0: i32, %arg1: i32) -> (i32, i32) {
    %c0_i32 = arith.constant 0 : i32
    %c0_i32_0 = arith.constant 0 : i32
    return %arg0, %c0_i32 : i32, i32
  }
  func.func @transform_1(%arg0: i32, %arg1: i32) -> (i32, i32) {
    %c0_i32 = arith.constant 0 : i32
    %c0_i32_0 = arith.constant 0 : i32
    return %arg0, %c0_i32 : i32, i32
  }
  func.func @transform_2(%arg0: i32, %arg1: i32) -> (i32, i32) {
    %c0_i32 = arith.constant 0 : i32
    %c0_i32_0 = arith.constant 0 : i32
    %c0_i32_1 = arith.constant 0 : i32
    return %c0_i32, %c0_i32_0 : i32, i32
  }
  func.func @transform_3(%arg0: i32, %arg1: i32) -> (i32, i32) {
    %c0_i32 = arith.constant 0 : i32
    %c0_i32_0 = arith.constant 0 : i32
    %c0_i32_1 = arith.constant 0 : i32
    return %c0_i32, %c0_i32_0 : i32, i32
  }
  func.func @transform_4(%arg0: i32, %arg1: i32) -> (i32, i32) {
    %c0_i32 = arith.constant 0 : i32
    %c0_i32_0 = arith.constant 0 : i32
    return %c0_i32, %arg1 : i32, i32
  }
  func.func @transform_5(%arg0: i32, %arg1: i32) -> (i32, i32) {
    %c0_i32 = arith.constant 0 : i32
    %c0_i32_0 = arith.constant 0 : i32
    return %c0_i32, %arg1 : i32, i32
  }
  func.func @transform_6(%arg0: i32, %arg1: i32) -> (i32, i32) {
    %c0_i32 = arith.constant 0 : i32
    %c0_i32_0 = arith.constant 0 : i32
    return %arg1, %c0_i32 : i32, i32
  }
  func.func @transform_7(%arg0: i32, %arg1: i32) -> (i32, i32) {
    %c0_i32 = arith.constant 0 : i32
    %c0_i32_0 = arith.constant 0 : i32
    %c0_i32_1 = arith.constant 0 : i32
    return %c0_i32, %c0_i32_0 : i32, i32
  }
  func.func @transform_8(%arg0: i32, %arg1: i32) -> (i32, i32) {
    %c0_i32 = arith.constant 0 : i32
    %c0_i32_0 = arith.constant 0 : i32
    return %arg0, %c0_i32 : i32, i32
  }
}

</mosaic_0001>

<bundles_post_ra>
// kernel: encoder_layer_forward.2
= control target key start
LH: loop header
LB: loop body
LE: loop exit
PB: predicated region body
PF: predicated region fallthrough
CT: control target
= control target key end

     0   :  { %s561_s12 = smov 0   ;;  %s563_s13 = smov 0   ;;  %s633_s0 = inlined_call_operand.vmem [shape: f32[2,8,32], index: 0, kind: input, shape index: {}]   ;;  %s634_s1 = inlined_call_operand.vmem [shape: f32[4,32,24], index: 1, kind: input, shape index: {}]   ;;  %s635_s2 = inlined_call_operand.vmem [shape: f32[4,1,24], index: 2, kind: input, shape index: {}]   ;;  %s636_s3 = inlined_call_operand.vmem [shape: f32[2,4,8,8], index: 3, kind: output, shape index: {}]  }
   0x1   :  { %s565_s14 = smov 0   ;;  %s567_s15 = smov 0  }
   0x2   :  { %s569_s16 = smov 0  }
   0x3 LB: > { %s22_s17 = sadd.s32 1, %s529_s14  ;;  %s25_s18 = sadd.s32 1, %s533_s15  ;;  %s537_s16 = sphi %s569_s16, %s13_s16   ;;  %s533_s15 = sphi %s567_s15, %s640_s15   ;;  %s529_s14 = sphi %s565_s14, %s639_s14   ;;  %s525_s13 = sphi %s563_s13, %s638_s13   ;;  %s521_s12 = sphi %s561_s12, %s637_s12  }
   0x4   : > { %p23_p0 = scmp.ge.s32.totalorder %s22_s17, 4  ;;  %p439_p1 = scmp.ge.s32.totalorder %s537_s16, 1 }
   0x5   : > { %p168_p2 = scmp.lt.s32.totalorder %s537_s16, 9 }
   0x6   : > { %s642_s17 = smov (%p23_p0, %s22_s17), 0  ;;  %s644_s18 = smov (!%p23_p0, %s25_s18), %s533_s15 }
   0x7   : > { %p169_p3 = pnand %p439_p1, %p168_p2  ;;  %p27_p4 = scmp.ge.s32.totalorder %s644_s18, 2 }
   0x8   : > { %p206_p5 = scmp.lt.s32.totalorder (!%p169_p3), %s521_s12, 3  ;;  %p202_p6 = scmp.lt.s32.totalorder (!%p169_p3), %s525_s13, 1 }
   0x9   : > { %s646_s18 = smov (%p27_p4, %s644_s18), 0  ;;  %172 = sbr.rel (%p169_p3) target bundleno = 800 (0x320), region = 32 }
   0xa   : > { %s539_s30 = smov (!%p169_p3), 120   ;;  %s540_s4 = smov (!%p169_p3), 112  }
   0xe   : > { %s648_s12 = smov (!%p206_p5, %s521_s12), 3  ;;  %s650_s13 = smov (!%p202_p6, %s525_s13), 1  ;;  %vm231_vm0 = vcmask 261120   ;;  %vm258_vm1 = vcmask 64512  }
   0xf   : > { %s451_s19 = sshll.u32 %s648_s12, 5  ;;  %s213_s22 = scalar_lea.vmem %s635_s2, %s648_s12 }
  0x10   : > { %s210_s25 = scalar_lea.vmem %s634_s1, %s451_s19  ;;  %s440_s26 = sshll.u32 %s650_s13, 3  ;;  %v494_v5 = vld [vmem:[%s213_s22] ss:$0 sm:$0xff] }
  0x11   : > { %v226_v0 = vld [vmem:[%s210_s25 + $0x18] sm:$0xff]  ;;  %v225_v1 = vld [vmem:[%s210_s25 + $0x10] sm:$0xff]  ;;  %v224_v2 = vld [vmem:[%s210_s25 + $0x8] sm:$0xff]  ;;  %s205_s29 = scalar_lea.vmem %s633_s0, %s440_s26  ;;  %s443_s5 = sshll.u32 %s650_s13, 2 }
  0x12   : > { %247 = vmatpush.msra.mxu0 %v226_v0  ;;  %v223_v3 = vld [vmem:[%s210_s25] sm:$0xff]  ;;  %s219_s6 = sadd.s32 %s443_s5, %s648_s12 }
  0x13   : > { %v222_v4 = vld [vmem:[%s205_s29] sm:$0xff]  ;;  %s444_s7 = sshll.u32 %s219_s6, 3 }
  0x14   : > { %248 = vmatpush.msra.mxu0 %v225_v1  ;;  %s221_s10 = scalar_lea.vmem %s636_s3, %s444_s7 }
  0x16   : > { %249 = vmatpush.msra.mxu0 %v224_v2 }
  0x18   : > { %250 = vmatpush.msra.mxu0 %v223_v3 }
  0x19   : > { %445 = vmatmul.msk.f32.vlgmr.msra.gmra.mxu0 %vm231_vm0, %v222_v4 }
  0x96   : > { %v252_v6 = vpop.f32.mrf.mxu0 }
  0x97   : > { %v253_v7 = vadd.f32 %v494_v5, %v252_v6 }
  0x99   : > { %256 = vrot.lane.b32.xlu0 %v253_v7, %s539_s30 }
 0x10b   : > { %v257_v8 = vpop.permute.xlu0 %256 }
 0x10c   : > { %446 = vmatpush.xpose.msk.msra.mxu1 %vm258_vm1, %v257_v8 }
 0x10f   : > { %447 = vmatmul.msk.f32.vlgmr.msra.gmra.mxu1 %vm258_vm1, %v253_v7 }
 0x18c   : > { %v280_v9 = vpop.f32.mrf.mxu1 }
 0x18d   : > { %v283_v10 = vsel %vm258_vm1, %v280_v9, -inf }
 0x18e   : > { %284 = vmax.xlane.f32.xlu0 %v283_v10 }
 0x201   : > { %v285_v11 = vpop.xlane.xlu0 %284 }
 0x202   : > { %v286_v12 = vsub.f32 %v280_v9, %v285_v11 }
 0x204   : > { %v287_v13 = vmul.f32 1.442695, %v286_v12 }
 0x206   : > { %495 = vpow2.f32 %v287_v13 }
 0x20c   : > { %v496_v14 = vpop.eup %495 }
 0x20d   : > { %v289_v15 = vsel %vm258_vm1, %v496_v14, 0.0 }
 0x20e   : > { %290 = vadd.xlane.f32.xlu1 %v289_v15 }
 0x227   : > { %307 = vrot.lane.b32.xlu1 %v253_v7, %s540_s4 }
 0x281   : > { %v291_v16 = vpop.xlane.xlu1 %290 }
 0x282   : > { %497 = vrcp.f32 %v291_v16  ;;  %v303_v22 = vand.u32 2147483648, %v291_v16  ;;  %vm297_vm3 = vweird.f32 %v291_v16  ;;  %v301_v23 = vand.u32 2147483647, %v291_v16 }
 0x284   : > { %v304_v25 = vor.u32 1.1754944e-38, %v303_v22  ;;  %vm302_vm5 = vcmp.eq.f32.partialorder %v301_v23, 8.507059e+37 }
 0x288   : > { %v498_v17 = vpop.eup %497 }
 0x289   : > { %v293_v18 = vmul.f32 %v498_v17, %v291_v16  ;;  %vm298_vm2 = vweird.f32 %v498_v17 }
 0x28a   : > { %vm299_vm4 = vmor %vm297_vm3, %vm298_vm2 }
 0x28b   : > { %v294_v19 = vsub.f32 1.0, %v293_v18 }
 0x28d   : > { %v295_v20 = vmul.f32 %v498_v17, %v294_v19 }
 0x28f   : > { %v296_v21 = vadd.f32 %v498_v17, %v295_v20 }
 0x291   : > { %v300_v24 = vsel %vm299_vm4, %v498_v17, %v296_v21 }
 0x292   : > { %v305_v26 = vsel %vm302_vm5, %v304_v25, %v300_v24 }
 0x293   : > { %v306_v28 = vmul.f32 %v496_v14, %v305_v26 }
 0x299   : > { %v308_v27 = vpop.permute.xlu1 %307 }
 0x29a   : > { %328 = vmatpush.msra.mxu2 %v308_v27 }
 0x29b   : > { %448 = vmatmul.msk.f32.vlgmr.msra.gmra.mxu2 %vm258_vm1, %v306_v28 }
 0x31e   : > { %v330_v29 = vpop.f32.mrf.mxu2 }
 0x31f   : > { %333 = vst.msk [vmem:[%s221_s10] sm:$0xff] %vm258_vm1, %v330_v29 }
 0x320 PF: > { %s13_s16 = sadd.s32 1, %s537_s16   ;;  %s637_s12 = smov %s529_s14 }
 0x321   : > { %p10_p7 = scmp.ge.s32.totalorder %s13_s16, 10   ;;  %s638_s13 = smov %s533_s15 }
 0x322   : > { %s639_s14 = smov %s642_s17  ;;  %s640_s15 = smov %s646_s18 }
 0x323   :  { %12 = sbr.rel (!%p10_p7) target bundleno = 3 (0x3), region = 68 }

// kernel: encoder_layer_forward.3
= control target key start
LH: loop header
LB: loop body
LE: loop exit
PB: predicated region body
PF: predicated region fallthrough
CT: control target
= control target key end

     0   :  { %vm40_vm0 = vcmask 261120   ;;  %s471_s0 = inlined_call_operand.vmem [shape: f32[16,32], index: 0, kind: input, shape index: {}]   ;;  %s472_s1 = inlined_call_operand.vmem [shape: f32[16,32], index: 1, kind: input, shape index: {}]   ;;  %s473_s2 = inlined_call_operand.vmem [shape: f32[1,32], index: 2, kind: input, shape index: {}]   ;;  %s474_s3 = inlined_call_operand.vmem [shape: f32[1,32], index: 3, kind: input, shape index: {}]   ;;  %s475_s4 = inlined_call_operand.vmem [shape: f32[32,64], index: 4, kind: input, shape index: {}]   ;;  %s476_s5 = inlined_call_operand.vmem [shape: f32[1,64], index: 5, kind: input, shape index: {}]   ;;  %s477_s6 = inlined_call_operand.vmem [shape: f32[64,32], index: 6, kind: input, shape index: {}]   ;;  %s478_s7 = inlined_call_operand.vmem [shape: f32[1,32], index: 7, kind: input, shape index: {}]   ;;  %s479_s8 = inlined_call_operand.hbm [shape: f32[16,32], index: 8, kind: output, shape index: {}]  }
   0x1   :  { %v35_v0 = vld [vmem:[%s471_s0 + $0x8] sm:$0xff]  ;;  %v34_v2 = vld [vmem:[%s471_s0] sm:$0xff] }
   0x2   :  { %v37_v1 = vld [vmem:[%s472_s1 + $0x8] sm:$0xff]  ;;  %v36_v4 = vld [vmem:[%s472_s1] sm:$0xff] }
   0x3   :  { %v39_v3 = vadd.f32 %v37_v1, %v35_v0 }
   0x4   :  { %13 = vsyncpa [#allocation5], 0  ;;  %v38_v6 = vadd.f32 %v36_v4, %v34_v2  ;;  %v336_v8 = vmov 32.0   ;;  %v113_v25 = vld [vmem:[%s475_s4 + $0x18] sm:$0xff]  ;;  %v112_v26 = vld [vmem:[%s475_s4 + $0x10] sm:$0xff]  ;;  %vm200_vm14 = vcmask 523264  }
   0x5   :  { %v44_v5 = vsel %vm40_vm0, %v39_v3, 0.0  ;;  %296 = vrcp.f32 %v336_v8  ;;  %275 = vmatpush.msra.mxu3 %v113_v25  ;;  %137 = vmatpush.msra.mxu0 %v113_v25  ;;  %v111_v29 = vld [vmem:[%s475_s4 + $0x8] sm:$0xff]  ;;  %v110_v31 = vld [vmem:[%s475_s4] sm:$0xff]  ;;  %v199_v59 = vld [vmem:[%s477_s6 + $0x38] sm:$0xff]  ;;  %s338_s14 = smov [#allocation4]   ;;  %s257_s18 = sshll.u32 %s479_s8, 4  ;;  %s258_s18 = int_to_ptr.hbm [resolvable:$true] %s257_s18 }
   0x6   :  { %45 = vadd.xlane.f32.xlu0 %v44_v5  ;;  %v41_v7 = vsel %vm40_vm0, %v38_v6, 0.0  ;;  %v292_v43 = vld [vmem:[%s473_s2] ss:$0 sm:$0xff]  ;;  %279 = vmatpush.msra.mxu2 %v199_v59  ;;  %v198_v60 = vld [vmem:[%s477_s6 + $0x30] sm:$0xff]  ;;  %v197_v61 = vld [vmem:[%s477_s6 + $0x28] sm:$0xff]  ;;  %s255_s15 = sshll.u32 %s338_s14, 4  ;;  %s256_s15 = int_to_ptr.vmem [resolvable:$true] %s255_s15 }
   0x7   :  { %276 = vmatpush.msra.mxu3 %v112_v26  ;;  %138 = vmatpush.msra.mxu0 %v112_v26  ;;  %v293_v46 = vld [vmem:[%s474_s3] ss:$0 sm:$0xff]  ;;  %v195_v63 = vld [vmem:[%s477_s6 + $0x18] sm:$0xff]  ;;  %v194_v1 = vld [vmem:[%s477_s6 + $0x10] sm:$0xff]  ;;  %s340_s19 = smov 8  }
   0x8   :  { %215 = vmatpush.msra.mxu1 %v199_v59  ;;  %280 = vmatpush.msra.mxu2 %v198_v60  ;;  %v196_v62 = vld [vmem:[%s477_s6 + $0x20] sm:$0xff] }
   0x9   :  { %277 = vmatpush.msra.mxu3 %v111_v29  ;;  %139 = vmatpush.msra.mxu0 %v111_v29  ;;  %v294_v0 = vld [vmem:[%s476_s5] ss:$0 sm:$0xff] }
   0xa   :  { %216 = vmatpush.msra.mxu1 %v198_v60  ;;  %281 = vmatpush.msra.mxu2 %v197_v61 }
   0xb   :  { %v297_v9 = vpop.eup %296  ;;  %278 = vmatpush.msra.mxu3 %v110_v31  ;;  %140 = vmatpush.msra.mxu0 %v110_v31 }
   0xc   :  { %v48_v10 = vmul.f32 32.0, %v297_v9  ;;  %vm52_vm1 = vweird.f32 %v297_v9  ;;  %217 = vmatpush.msra.mxu1 %v197_v61  ;;  %282 = vmatpush.msra.mxu2 %v196_v62 }
   0xe   :  { %42 = vadd.xlane.f32.xlu0 %v41_v7  ;;  %v49_v11 = vsub.f32 1.0, %v48_v10  ;;  %218 = vmatpush.msra.mxu1 %v196_v62 }
   0xf   :  { %283 = vmatpush.msra.mxu2 %v195_v63 }
  0x10   :  { %v50_v12 = vmul.f32 %v297_v9, %v49_v11  ;;  %219 = vmatpush.msra.mxu1 %v195_v63 }
  0x11   :  { %284 = vmatpush.msra.mxu2 %v194_v1 }
  0x12   :  { %v51_v13 = vadd.f32 %v297_v9, %v50_v12  ;;  %220 = vmatpush.msra.mxu1 %v194_v1  ;;  %v337_v12 = vmov 0.0  }
  0x13   :  { %106 = vst.msk [vmem:[#allocation3] sm:$0xff] %vm40_vm0, %v337_v12 }
  0x14   :  { %v53_v14 = vsel %vm52_vm1, %v297_v9, %v51_v13  ;;  %107 = vst.msk [vmem:[#allocation3 + $0x8] sm:$0xff] %vm40_vm0, %v337_v12 }
  0x79   :  { %v46_v15 = vpop.xlane.xlu0 %45 }
  0x7a   :  { %v55_v16 = vmul.f32 %v53_v14, %v46_v15 }
  0x7c   :  { %v57_v17 = vsub.f32 %v39_v3, %v55_v16  ;;  %v193_v3 = vld [vmem:[%s477_s6 + $0x8] sm:$0xff] }
  0x7d   :  { %285 = vmatpush.msra.mxu2 %v193_v3  ;;  %221 = vmatpush.msra.mxu1 %v193_v3 }
  0x7e   :  { %v59_v18 = vmul.f32 %v57_v17, %v57_v17 }
  0x80   :  { %v63_v19 = vsel %vm40_vm0, %v59_v18, 0.0 }
  0x81   :  { %64 = vadd.xlane.f32.xlu1 %v63_v19  ;;  %v43_v20 = vpop.xlane.xlu0 %42 }
  0x82   :  { %v54_v21 = vmul.f32 %v53_v14, %v43_v20 }
  0x84   :  { %v56_v22 = vsub.f32 %v38_v6, %v54_v21  ;;  %v192_v6 = vld [vmem:[%s477_s6] sm:$0xff] }
  0x85   :  { %286 = vmatpush.msra.mxu2 %v192_v6  ;;  %222 = vmatpush.msra.mxu1 %v192_v6 }
  0x86   :  { %v58_v23 = vmul.f32 %v56_v22, %v56_v22 }
  0x88   :  { %v60_v24 = vsel %vm40_vm0, %v58_v23, 0.0 }
  0x89   :  { %61 = vadd.xlane.f32.xlu1 %v60_v24 }
  0xf4   :  { %v65_v27 = vpop.xlane.xlu1 %64 }
  0xf5   :  { %v67_v28 = vmul.f32 %v65_v27, %v53_v14 }
  0xf7   :  { %v69_v30 = vadd.f32 1e-05, %v67_v28 }
  0xf9   :  { %298 = vrsqrt.f32 %v69_v30  ;;  %vm86_vm3 = vweird.f32 %v69_v30 }
  0xfc   :  { %v62_v32 = vpop.xlane.xlu1 %61 }
  0xfd   :  { %v66_v33 = vmul.f32 %v62_v32, %v53_v14 }
  0xff   :  { %v299_v34 = vpop.eup %298  ;;  %v68_v35 = vadd.f32 1e-05, %v66_v33 }
 0x100   :  { %v81_v36 = vmul.f32 %v299_v34, %v69_v30  ;;  %vm87_vm2 = vweird.f32 %v299_v34 }
 0x101   :  { %300 = vrsqrt.f32 %v68_v35  ;;  %vm88_vm4 = vmor %vm86_vm3, %vm87_vm2  ;;  %vm76_vm6 = vweird.f32 %v68_v35 }
 0x102   :  { %v82_v37 = vmul.f32 %v299_v34, %v81_v36 }
 0x104   :  { %v83_v38 = vmul.f32 0.5, %v82_v37 }
 0x106   :  { %v84_v39 = vsub.f32 1.5, %v83_v38 }
 0x107   :  { %v301_v40 = vpop.eup %300 }
 0x108   :  { %v85_v41 = vmul.f32 %v299_v34, %v84_v39  ;;  %v71_v42 = vmul.f32 %v301_v40, %v68_v35  ;;  %vm77_vm5 = vweird.f32 %v301_v40  ;;  %v190_v39 = vld [vmem:[#allocation3] sm:$0xff] }
 0x109   :  { %vm78_vm7 = vmor %vm76_vm6, %vm77_vm5 }
 0x10a   :  { %v89_v44 = vsel %vm88_vm4, %v299_v34, %v85_v41  ;;  %v72_v45 = vmul.f32 %v301_v40, %v71_v42  ;;  %v191_v42 = vld [vmem:[#allocation3 + $0x8] sm:$0xff] }
 0x10b   :  { %v91_v47 = vmul.f32 %v89_v44, %v57_v17 }
 0x10c   :  { %v73_v48 = vmul.f32 0.5, %v72_v45  ;;  %v295_v45 = vld [vmem:[%s478_s7] ss:$0 sm:$0xff]  ;;  %s339_s7 = smov 128  }
 0x10d   :  { %v97_v49 = vmul.f32 %v292_v43, %v91_v47 }
 0x10e   :  { %v74_v50 = vsub.f32 1.5, %v73_v48 }
 0x10f   :  { %v103_v51 = vadd.f32 %v293_v46, %v97_v49 }
 0x110   :  { %v75_v52 = vmul.f32 %v301_v40, %v74_v50 }
 0x111   :  { %105 = vst.msk [vmem:[#allocation2 + $0x8] sm:$0xff] %vm40_vm0, %v103_v51 }
 0x112   :  { %v79_v53 = vsel %vm78_vm7, %v301_v40, %v75_v52 }
 0x113   :  { %v90_v54 = vmul.f32 %v79_v53, %v56_v22 }
 0x115   :  { %v96_v55 = vmul.f32 %v292_v43, %v90_v54 }
 0x117   :  { %v102_v56 = vadd.f32 %v293_v46, %v96_v55 }
 0x118   :  { %v421_v57 = vld [vmem:[#allocation2 + $0x8] sm:$0xff] }
 0x119   :  { %104 = vst.msk [vmem:[#allocation2] sm:$0xff] %vm40_vm0, %v102_v56  ;;  %270 = vmatmul.msk.f32.vlgmr.msra.gmra.mxu3 %vm40_vm0, %v421_v57 }
 0x120   :  { %v426_v58 = vld [vmem:[#allocation2] sm:$0xff] }
 0x121   :  { %269 = vmatmul.msk.f32.vlgmr.msra.gmra.mxu0 %vm40_vm0, %v426_v58 }
 0x19c   :  { %v145_v2 = vpop.f32.mrf.mxu3 }
 0x19d   :  { %v146_v4 = vadd.f32 %v294_v0, %v145_v2 }
 0x19e   :  { %v142_v5 = vpop.f32.mrf.mxu0 }
 0x19f   :  { %v272_v7 = vmul.f32 -1.702, %v146_v4  ;;  %v143_v8 = vadd.f32 %v294_v0, %v142_v5 }
 0x1a1   :  { %v154_v9 = vmul.f32 1.442695, %v272_v7  ;;  %v271_v10 = vmul.f32 -1.702, %v143_v8 }
 0x1a3   :  { %302 = vpow2.f32 %v154_v9  ;;  %v152_v11 = vmul.f32 1.442695, %v271_v10 }
 0x1a5   :  { %304 = vpow2.f32 %v152_v11 }
 0x1a9   :  { %v303_v13 = vpop.eup %302 }
 0x1aa   :  { %v157_v14 = vadd.f32 1.0, %v303_v13 }
 0x1ab   :  { %v305_v15 = vpop.eup %304 }
 0x1ac   :  { %306 = vrcp.f32 %v157_v14  ;;  %v156_v16 = vadd.f32 1.0, %v305_v15  ;;  %v184_v21 = vand.u32 2147483648, %v157_v14  ;;  %v182_v24 = vand.u32 2147483647, %v157_v14 }
 0x1ad   :  { %vm178_vm9 = vweird.f32 %v157_v14 }
 0x1ae   :  { %308 = vrcp.f32 %v156_v16  ;;  %v169_v27 = vand.u32 2147483648, %v156_v16  ;;  %v185_v28 = vor.u32 1.1754944e-38, %v184_v21  ;;  %v167_v30 = vand.u32 2147483647, %v156_v16 }
 0x1af   :  { %vm183_vm12 = vcmp.eq.f32.partialorder %v182_v24, 8.507059e+37  ;;  %vm163_vm13 = vweird.f32 %v156_v16 }
 0x1b0   :  { %v170_v35 = vor.u32 1.1754944e-38, %v169_v27  ;;  %vm168_vm1 = vcmp.eq.f32.partialorder %v167_v30, 8.507059e+37 }
 0x1b2   :  { %v307_v17 = vpop.eup %306 }
 0x1b3   :  { %v174_v18 = vmul.f32 %v307_v17, %v157_v14  ;;  %vm179_vm8 = vweird.f32 %v307_v17 }
 0x1b4   :  { %v309_v19 = vpop.eup %308  ;;  %vm180_vm10 = vmor %vm178_vm9, %vm179_vm8 }
 0x1b5   :  { %v175_v20 = vsub.f32 1.0, %v174_v18  ;;  %v159_v22 = vmul.f32 %v309_v19, %v156_v16  ;;  %vm164_vm11 = vweird.f32 %v309_v19 }
 0x1b6   :  { %vm165_vm15 = vmor %vm163_vm13, %vm164_vm11 }
 0x1b7   :  { %v176_v23 = vmul.f32 %v307_v17, %v175_v20  ;;  %v160_v25 = vsub.f32 1.0, %v159_v22 }
 0x1b9   :  { %v177_v26 = vadd.f32 %v307_v17, %v176_v23  ;;  %v161_v29 = vmul.f32 %v309_v19, %v160_v25 }
 0x1bb   :  { %v181_v31 = vsel %vm180_vm10, %v307_v17, %v177_v26  ;;  %v162_v33 = vadd.f32 %v309_v19, %v161_v29 }
 0x1bc   :  { %v186_v32 = vsel %vm183_vm12, %v185_v28, %v181_v31 }
 0x1bd   :  { %v189_v34 = vmul.f32 %v186_v32, %v146_v4  ;;  %v166_v36 = vsel %vm165_vm15, %v309_v19, %v162_v33 }
 0x1be   :  { %v171_v37 = vsel %vm168_vm1, %v170_v35, %v166_v36 }
 0x1bf   :  { %274 = vmatmul.msk.f32.vlgmr.msra.gmra.mxu2 %vm200_vm14, %v189_v34  ;;  %v188_v38 = vmul.f32 %v171_v37, %v143_v8 }
 0x1c1   :  { %273 = vmatmul.msk.f32.vlgmr.msra.gmra.mxu1 %vm200_vm14, %v188_v38 }
 0x23e   :  { %v224_v40 = vpop.f32.mrf.mxu1 }
 0x23f   :  { %v230_v41 = vadd.f32 %v224_v40, %v190_v39 }
 0x241   :  { %232 = vst.msk [vmem:[#allocation3] sm:$0xff] %vm40_vm0, %v230_v41 }
 0x242   :  { %v227_v43 = vpop.f32.mrf.mxu2 }
 0x243   :  { %v231_v44 = vadd.f32 %v227_v43, %v191_v42 }
 0x245   :  { %233 = vst.msk [vmem:[#allocation3 + $0x8] sm:$0xff] %vm40_vm0, %v231_v44 }
 0x248   :  { %v237_v46 = vld [vmem:[#allocation3] sm:$0xff] }
 0x249   :  { %v243_v47 = vadd.f32 %v295_v45, %v237_v46 }
 0x24b   :  { %v247_v49 = vadd.f32 %v243_v47, %v426_v58 }
 0x24c   :  { %v238_v48 = vld [vmem:[#allocation3 + $0x8] sm:$0xff] }
 0x24d   :  { %v244_v50 = vadd.f32 %v295_v45, %v238_v48  ;;  %249 = vst.msk [vmem:[#allocation4] sm:$0xff] %vm40_vm0, %v247_v49 }
 0x24f   :  { %v248_v51 = vadd.f32 %v244_v50, %v421_v57 }
 0x251   :  { %250 = vst.msk [vmem:[#allocation4 + $0x8] sm:$0xff] %vm40_vm0, %v248_v51 }
 0x252   :  { %263 = dma.vmem_to_hbm [thread:$0]  %s256_s15, 256, %s258_s18, [#allocation5], %s339_s7, %s339_s7, %s340_s19  }
 0x253   :  { %334 = dma.done.wait [#allocation5], 256  }
 0x254   :  { %335 = vsyncadd [#allocation5], 4294967040 }
 0x255   :  { %268 = vsyncpa [#allocation5], 1 }

</bundles_post_ra>
